<compile_context>
chip_gen: v7x
topology: tpu7x:2x2x1
jax: 0.10.0
libtpu: 0.0.40
codegen_flags: <defaults>
</compile_context>

<pallas_src>
import numpy as np
import jax
import jax.numpy as jnp
from jax.experimental import pallas as pl
from jax.experimental.pallas import tpu as pltpu


# ----------------------------------------------------------------------------
# helpers (plain numpy / JAX glue, matching the torch module)
# ----------------------------------------------------------------------------
def perspective_projection(focal, center):
    return np.array(
        [focal, 0, center, 0, focal, center, 0, 0, 1]
    ).reshape([3, 3]).astype(np.float32).transpose()


def compute_rotation(angles):
    """angles: [B,3] -> rot: [B,3,3]  (exact port of torch compute_rotation)."""
    b = angles.shape[0]
    x, y, z = angles[:, 0], angles[:, 1], angles[:, 2]
    cx, sx = jnp.cos(x), jnp.sin(x)
    cy, sy = jnp.cos(y), jnp.sin(y)
    cz, sz = jnp.cos(z), jnp.sin(z)
    one = jnp.ones_like(x)
    zero = jnp.zeros_like(x)
    rot_x = jnp.stack([one, zero, zero, zero, cx, -sx, zero, sx, cx], 1).reshape(b, 3, 3)
    rot_y = jnp.stack([cy, zero, sy, zero, one, zero, -sy, zero, cy], 1).reshape(b, 3, 3)
    rot_z = jnp.stack([cz, -sz, zero, sz, cz, zero, zero, zero, one], 1).reshape(b, 3, 3)
    rot = rot_z @ rot_y @ rot_x
    return jnp.transpose(rot, (0, 2, 1))


def _round_up(n, m):
    return ((n + m - 1) // m) * m


def _pad_last(x, multiple):
    """Zero-pad the last axis to a multiple of `multiple` (no-op if aligned)."""
    n = x.shape[-1]
    pad = (-n) % multiple
    if pad == 0:
        return x
    widths = [(0, 0)] * (x.ndim - 1) + [(0, pad)]
    return jnp.pad(x, widths)


def _pick_lane_tile(n, max_tile=8192):
    """Lane-tile for the matmul: full extent if small, else a multiple-of-128
    divisor of n <= max_tile (n is always a multiple of 128 here)."""
    if n <= max_tile:
        return n
    t = (max_tile // 128) * 128
    while t >= 128:
        if n % t == 0:
            return t
        t -= 128
    return 128


def _pick_s_tile(s, max_tile=512):
    """Sublane-tile for pointwise kernels: full extent if small, else a
    multiple-of-8 divisor of s <= max_tile; fall back to full extent."""
    if s <= max_tile:
        return s
    t = (max_tile // 8) * 8
    while t >= 8:
        if s % t == 0:
            return t
        t -= 8
    return s


# ----------------------------------------------------------------------------
# Kernel 1: computeShape   vertices = mean + coeff @ basis
#   coeff: [B, K] (bf16),  basis: [K, 3*Vp] channel-major (bf16),
#   mean:  [1, 3*Vp] (f32) ->  [B, 3*Vp] f32 (reshapes to [B, 3, Sv, 128] free)
#   HBM-bound (M=B is tiny): big lane tiles amortize per-step overhead.
# ----------------------------------------------------------------------------
def shape_matmul_kernel(coeff_ref, basis_ref, mean_ref, out_ref):
    out_ref[...] = mean_ref[...] + jnp.dot(
        coeff_ref[...], basis_ref[...], preferred_element_type=jnp.float32
    )


def compute_shape_pallas(coeff, basis, mean_flat, max_tile=8192):
    B, K = coeff.shape
    _, N = basis.shape                      # N = 3*Vp, multiple of 128 by setup
    tn = _pick_lane_tile(N, max_tile)
    return pl.pallas_call(
        shape_matmul_kernel,
        out_shape=jax.ShapeDtypeStruct((B, N), jnp.float32),
        grid=(N // tn,),
        in_specs=[
            pl.BlockSpec((B, K), lambda j: (0, 0)),
            pl.BlockSpec((K, tn), lambda j: (0, j)),
            pl.BlockSpec((1, tn), lambda j: (0, j)),
        ],
        out_specs=pl.BlockSpec((B, tn), lambda j: (0, j)),
        compiler_params=pltpu.CompilerParams(dimension_semantics=("parallel",)),
    )(coeff, basis, mean_flat)


# ----------------------------------------------------------------------------
# Kernel 2: transform + to_camera + to_image  (fused, affine part pre-folded)
#   params: [B, 12] f32 in SMEM:
#     numx = x*p0 + y*p1 + z*p2  + p3
#     numy = x*p4 + y*p5 + z*p6  + p7
#     cz   = x*p8 + y*p9 + z*p10 + p11     (cz = camera_d - z_cam)
#     px = numx / cz ; py = numy / cz
#   verts: [B, 3, S, 128]  ->  out: [B, 2, S, 128]
# ----------------------------------------------------------------------------
def transform_project_kernel(p_ref, v_ref, o_ref):
    b = pl.program_id(0)
    x = v_ref[0]
    y = v_ref[1]
    z = v_ref[2]
    numx = x * p_ref[b, 0] + y * p_ref[b, 1] + z * p_ref[b, 2] + p_ref[b, 3]
    numy = x * p_ref[b, 4] + y * p_ref[b, 5] + z * p_ref[b, 6] + p_ref[b, 7]
    cz = x * p_ref[b, 8] + y * p_ref[b, 9] + z * p_ref[b, 10] + p_ref[b, 11]
    # approx reciprocal on the EUP + one Newton step (error ~1e-7, well inside
    # the projection tolerance), instead of a multi-op f32 divide on the VALU.
    inv = pl.reciprocal(cz, approx=True)
    inv = inv * (2.0 - cz * inv)
    o_ref[0, :, :] = numx * inv
    o_ref[1, :, :] = numy * inv


def transform_project_pallas(verts_dense, rot, trans, focal, center, camera_d):
    B, _, S, _ = verts_dense.shape
    R = rot.astype(jnp.float32)
    t = trans.astype(jnp.float32)
    off = camera_d - t[:, 2]                                  # [B]
    params = jnp.concatenate(
        [
            focal * R[:, :, 0] - center * R[:, :, 2],         # x-numerator coeffs
            (focal * t[:, 0] + center * off)[:, None],
            focal * R[:, :, 1] - center * R[:, :, 2],         # y-numerator coeffs
            (focal * t[:, 1] + center * off)[:, None],
            -R[:, :, 2],                                      # cz coeffs
            off[:, None],
        ],
        axis=1,
    ).astype(jnp.float32)                                     # [B, 12]

    st = _pick_s_tile(S)
    v_spec = pl.BlockSpec((None, 3, st, 128), lambda b, j: (b, 0, j, 0))
    o_spec = pl.BlockSpec((None, 2, st, 128), lambda b, j: (b, 0, j, 0))
    return pl.pallas_call(
        transform_project_kernel,
        out_shape=jax.ShapeDtypeStruct((B, 2, S, 128), jnp.float32),
        grid=(B, S // st),
        in_specs=[pl.BlockSpec(memory_space=pltpu.MemorySpace.SMEM), v_spec],
        out_specs=o_spec,
        compiler_params=pltpu.CompilerParams(
            dimension_semantics=("parallel", "parallel")),
    )(params, verts_dense)


# ----------------------------------------------------------------------------
# Kernel 3a: face normals = normalize(cross(v1 - v2, v2 - v3))
#   v1, v2, v3: [B, 3, S, 128]   ->  [B, 3, S, 128]
# ----------------------------------------------------------------------------
def face_normal_kernel(v1_ref, v2_ref, v3_ref, o_ref):
    e1x = v1_ref[0] - v2_ref[0]
    e1y = v1_ref[1] - v2_ref[1]
    e1z = v1_ref[2] - v2_ref[2]
    e2x = v2_ref[0] - v3_ref[0]
    e2y = v2_ref[1] - v3_ref[1]
    e2z = v2_ref[2] - v3_ref[2]
    nx = e1y * e2z - e1z * e2y
    ny = e1z * e2x - e1x * e2z
    nz = e1x * e2y - e1y * e2x
    inv = jax.lax.rsqrt(jnp.maximum(nx * nx + ny * ny + nz * nz, 1e-24))
    o_ref[0, :, :] = nx * inv
    o_ref[1, :, :] = ny * inv
    o_ref[2, :, :] = nz * inv


def face_normals_pallas(v1, v2, v3):
    B, _, S, _ = v1.shape
    st = _pick_s_tile(S)
    spec = pl.BlockSpec((None, 3, st, 128), lambda b, j: (b, 0, j, 0))
    return pl.pallas_call(
        face_normal_kernel,
        out_shape=jax.ShapeDtypeStruct((B, 3, S, 128), jnp.float32),
        grid=(B, S // st),
        in_specs=[spec, spec, spec],
        out_specs=spec,
        compiler_params=pltpu.CompilerParams(
            dimension_semantics=("parallel", "parallel")),
    )(v1.astype(jnp.float32), v2.astype(jnp.float32), v3.astype(jnp.float32))


# ----------------------------------------------------------------------------
# Kernel 3b: L2-normalize over the channel axis   x: [B, 3, S, 128]
# ----------------------------------------------------------------------------
def l2_normalize_kernel(x_ref, o_ref):
    x0 = x_ref[0]
    x1 = x_ref[1]
    x2 = x_ref[2]
    inv = jax.lax.rsqrt(jnp.maximum(x0 * x0 + x1 * x1 + x2 * x2, 1e-24))
    o_ref[0, :, :] = x0 * inv
    o_ref[1, :, :] = x1 * inv
    o_ref[2, :, :] = x2 * inv


def l2_normalize_pallas(x_dense):
    B, _, S, _ = x_dense.shape
    st = _pick_s_tile(S)
    spec = pl.BlockSpec((None, 3, st, 128), lambda b, j: (b, 0, j, 0))
    return pl.pallas_call(
        l2_normalize_kernel,
        out_shape=jax.ShapeDtypeStruct((B, 3, S, 128), jnp.float32),
        grid=(B, S // st),
        in_specs=[spec],
        out_specs=spec,
        compiler_params=pltpu.CompilerParams(
            dimension_semantics=("parallel", "parallel")),
    )(x_dense.astype(jnp.float32))


def compute_normals(verts_flat, faces_padded, point_buf_padded, SV, SF):
    """computeNormals port on the padded dense layout.
    verts_flat: [B, 3*Vp]  ->  vertex normals [B, 3, SV, 128]."""
    B = verts_flat.shape[0]
    Vp = SV * 128
    Fp = SF * 128
    verts_b3v = verts_flat.reshape(B, 3, Vp)
    # one merged gather for all three face corners (padded faces are degenerate
    # [0,0,0] -> zero normal), then free reshapes into the dense layout
    idx = faces_padded.T.reshape(-1)                               # [3*Fp]
    g = verts_b3v[:, :, idx].reshape(B, 3, 3, SF, 128)
    fn = face_normals_pallas(g[:, :, 0], g[:, :, 1], g[:, :, 2])   # [B,3,SF,128]
    fn_flat = fn.reshape(B, 3, Fp)
    # TODO(synk): per-lane dynamic gather of point_buf has no clean Mosaic
    # lowering; the 8-way incidence sum stays in JAX, summed per neighbour so
    # the [B,3,Vp,8] intermediate never hits HBM.  Normalize runs in Pallas.
    vn = fn_flat[:, :, point_buf_padded[:, 0]]
    for k in range(1, point_buf_padded.shape[1]):
        vn = vn + fn_flat[:, :, point_buf_padded[:, k]]            # [B,3,Vp]
    return l2_normalize_pallas(vn.reshape(B, 3, SV, 128))          # [B,3,SV,128]


# ----------------------------------------------------------------------------
# Kernel 4: get_view_reflect (mode='ortho') — reflect only; view_dir is constant
#   normal: [B, 3, S, 128]  ->  reflect [B, 3, S, 128]
# ----------------------------------------------------------------------------
_ORTHO_C = float(1.0 / np.sqrt(1.0 + 1e-6))   # |[0,0,-1]|^2 + 1e-6 normalization


def reflect_kernel(n_ref, rf_ref):
    nx = n_ref[0]
    ny = n_ref[1]
    nz = n_ref[2]
    m = (2.0 * _ORTHO_C) * nz                 # = -2 * dot(view_dir, normal)
    rf_ref[0, :, :] = m * nx
    rf_ref[1, :, :] = m * ny
    rf_ref[2, :, :] = m * nz - _ORTHO_C


def get_view_reflect_pallas(normal_bchw):
    B, C, H, W = normal_bchw.shape
    N = H * W
    Np = _round_up(N, 128)
    S = Np // 128
    x = _pad_last(normal_bchw.reshape(B, C, N).astype(jnp.float32), 128)
    x = x.reshape(B, C, S, 128)
    st = _pick_s_tile(S)
    spec = pl.BlockSpec((None, 3, st, 128), lambda b, j: (b, 0, j, 0))
    rf = pl.pallas_call(
        reflect_kernel,
        out_shape=jax.ShapeDtypeStruct((B, 3, S, 128), jnp.float32),
        grid=(B, S // st),
        in_specs=[spec],
        out_specs=spec,
        compiler_params=pltpu.CompilerParams(
            dimension_semantics=("parallel", "parallel")),
    )(x)
    rf = rf.reshape(B, 3, Np)[:, :, :N].reshape(B, 3, H, W)
    # view_dir is a constant [0, 0, -c] — free broadcast, no kernel store traffic
    view_dir = jnp.broadcast_to(
        jnp.array([0.0, 0.0, -_ORTHO_C], jnp.float32)[None, :, None, None],
        (B, 3, H, W))
    return view_dir, rf


# ----------------------------------------------------------------------------
# main
# ----------------------------------------------------------------------------
if __name__ == "__main__":
    key = jax.random.PRNGKey(0)
    ks = jax.random.split(key, 12)

    # model constants (opt)
    FOCAL, CENTER, CAMERA_D = 1015.0, 112.0, 10.0
    B = 2
    K_SHAPE, K_EXP = 80, 64
    H = W = 16

    # ---- synthetic "BFM": a well-conditioned G x G grid mesh (height field) ----
    G = 16
    V = G * G                                            # 256 vertices
    gy, gx = jnp.meshgrid(jnp.arange(G, dtype=jnp.float32),
                          jnp.arange(G, dtype=jnp.float32), indexing="ij")
    base = jnp.stack([gx.reshape(-1), gy.reshape(-1),
                      jnp.zeros((V,), jnp.float32)], axis=1)          # [V, 3]
    shapeMean = base + 0.05 * jax.random.normal(ks[0], (V, 3), jnp.float32)
    shapePca = 0.01 * jax.random.normal(ks[1], (K_SHAPE, V, 3), jnp.float32)
    expPca = 0.01 * jax.random.normal(ks[2], (K_EXP, V, 3), jnp.float32)

    faces_list = []
    for i in range(G - 1):
        for j in range(G - 1):
            v00 = i * G + j
            v01 = v00 + 1
            v10 = v00 + G
            v11 = v10 + 1
            faces_list.append([v00, v10, v01])
            faces_list.append([v01, v10, v11])
    faces_np = np.asarray(faces_list, np.int32)
    F = faces_np.shape[0]                                 # 450 faces

    # ---- one-time padded model setup (no per-call pad/slice round-trips) ----
    Vp = _round_up(V, 128)
    SV = Vp // 128
    Fp = _round_up(F + 1, 128)                            # +1 guarantees a degenerate slot
    SF = Fp // 128
    faces_pad_np = np.zeros((Fp, 3), np.int32)            # padded faces -> zero normal
    faces_pad_np[:F] = faces_np

    # point_buf: up to 8 incident faces per vertex, padded with F (degenerate
    # face whose normal is exactly zero); rows >= V also point at F.
    pb_np = np.full((Vp, 8), F, np.int32)
    cnt = np.zeros((V,), np.int32)
    for fidx, tri in enumerate(faces_np):
        for v in tri:
            if cnt[v] < 8:
                pb_np[v, cnt[v]] = fidx
                cnt[v] += 1
    faces_padded = jnp.asarray(faces_pad_np)
    point_buf_padded = jnp.asarray(pb_np)
    persc_proj_np = perspective_projection(FOCAL, CENTER)

    # channel-major, V padded to Vp, built once (bf16 basis halves HBM traffic;
    # the f32 mean-dominant component and f32 accumulation keep absolute error small)
    mean_centered = shapeMean - jnp.mean(shapeMean, axis=0, keepdims=True)

    def _to_cm(pca):                                       # [K,V,3] -> [K, 3*Vp]
        kk = pca.shape[0]
        p = jnp.transpose(pca, (0, 2, 1))                  # [K,3,V]
        p = jnp.pad(p, ((0, 0), (0, 0), (0, Vp - V)))
        return p.reshape(kk, 3 * Vp)

    basis_cm = jnp.concatenate([_to_cm(shapePca), _to_cm(expPca)],
                               axis=0).astype(jnp.bfloat16)           # [K, 3*Vp]
    mean_cm = jnp.pad(jnp.transpose(mean_centered, (1, 0)),
                      ((0, 0), (0, Vp - V))).reshape(1, 3 * Vp)        # [1, 3*Vp] f32

    # ---- inputs ----
    shapeCoef = jax.random.normal(ks[5], (B, K_SHAPE), jnp.float32)
    expCoef = jax.random.normal(ks[6], (B, K_EXP), jnp.float32)
    angles = 0.3 * jax.random.normal(ks[7], (B, 3), jnp.float32)
    trans = 0.1 * jax.random.normal(ks[8], (B, 3), jnp.float32)
    normal_img = jax.random.normal(ks[9], (B, 3, H, W), jnp.float32)
    normal_img = normal_img / jnp.linalg.norm(normal_img, axis=1, keepdims=True)

    # ---- computeShape (Pallas matmul, bf16 basis, channel-major dense output) ----
    coeff = jnp.concatenate([shapeCoef, expCoef], axis=1).astype(jnp.bfloat16)
    verts_flat = compute_shape_pallas(coeff, basis_cm, mean_cm)        # [B, 3*Vp] f32
    verts_dense = verts_flat.reshape(B, 3, SV, 128)                    # free reshape
    verts_b3v = verts_flat.reshape(B, 3, Vp)
    verts_bv3 = jnp.transpose(verts_b3v[:, :, :V], (0, 2, 1))          # test-only

    ref_verts = (np.asarray(mean_centered, np.float64)[None]
                 + np.einsum('ni,ijk->njk', np.asarray(shapeCoef, np.float64),
                             np.asarray(shapePca, np.float64))
                 + np.einsum('ni,ijk->njk', np.asarray(expCoef, np.float64),
                             np.asarray(expPca, np.float64)))
    np.testing.assert_allclose(np.asarray(verts_bv3), ref_verts,
                               rtol=2e-2, atol=1e-2)

    # ---- transform + to_camera + to_image (Pallas fused, folded affine) ----
    rot = compute_rotation(angles)                                     # [B, 3, 3]
    img_dense = transform_project_pallas(verts_dense, rot, trans,
                                         FOCAL, CENTER, CAMERA_D)      # [B,2,SV,128]
    face_proj = jnp.transpose(img_dense.reshape(B, 2, Vp)[:, :, :V], (0, 2, 1))

    # float64 reference computed from the SAME vertices the kernel consumed
    verts_np = np.asarray(verts_bv3, np.float64)
    ref_cam = verts_np @ np.asarray(rot, np.float64) \
        + np.asarray(trans, np.float64)[:, None, :]
    ref_cam[..., 2] = CAMERA_D - ref_cam[..., 2]
    ref_proj = ref_cam @ persc_proj_np.astype(np.float64)
    ref_img = ref_proj[..., :2] / ref_proj[..., 2:]
    np.testing.assert_allclose(np.asarray(face_proj), ref_img,
                               rtol=2e-3, atol=2e-2)

    # ---- computeNormals (Pallas cross + normalize, dense channel-major) ----
    vn_dense = compute_normals(verts_flat, faces_padded, point_buf_padded, SV, SF)
    vert_norm = jnp.transpose(vn_dense.reshape(B, 3, Vp)[:, :, :V], (0, 2, 1))

    rv1 = verts_np[:, faces_np[:, 0]]
    rv2 = verts_np[:, faces_np[:, 1]]
    rv3 = verts_np[:, faces_np[:, 2]]
    rfn = np.cross(rv1 - rv2, rv2 - rv3)
    rfn = rfn / np.maximum(np.linalg.norm(rfn, axis=-1, keepdims=True), 1e-12)
    rfn = np.concatenate([rfn, np.zeros((B, 1, 3))], axis=1)           # zero at index F
    rvn = np.sum(rfn[:, pb_np[:V]], axis=2)
    rvn = rvn / np.maximum(np.linalg.norm(rvn, axis=-1, keepdims=True), 1e-12)
    np.testing.assert_allclose(np.asarray(vert_norm), rvn,
                               rtol=2e-2, atol=2e-2)

    # ---- get_view_reflect, mode='ortho' (Pallas reflect, constant view_dir) ----
    view_dir, reflect = get_view_reflect_pallas(normal_img)
    ref_vd = np.broadcast_to(
        np.array([0, 0, -_ORTHO_C], np.float32)[None, :, None, None], (B, 3, H, W))
    dot = np.sum(ref_vd * np.asarray(normal_img), axis=1, keepdims=True)
    ref_rf = ref_vd - 2 * dot * np.asarray(normal_img)
    np.testing.assert_allclose(np.asarray(view_dir), ref_vd, rtol=1e-5, atol=1e-5)
    np.testing.assert_allclose(np.asarray(reflect), ref_rf, rtol=1e-4, atol=1e-4)

    jax.block_until_ready((verts_dense, face_proj, vert_norm, view_dir, reflect))
    print("KERNEL_OK")
</pallas_src>

<mosaic_0001>
module attributes {stable_mosaic.version = 11 : i64} {
  func.func @shape_matmul_kernel(%arg0: i32, %arg1: memref<2x144xbf16, #tpu.memory_space<vmem>>, %arg2: memref<144x768xbf16, #tpu.memory_space<vmem>>, %arg3: memref<1x768xf32, #tpu.memory_space<vmem>>, %arg4: memref<2x768xf32, #tpu.memory_space<vmem>>) attributes {dimension_semantics = [#tpu.dimension_semantics<parallel>], iteration_bounds = array<i64: 1>, scalar_prefetch = 0 : i64, scratch_operands = 0 : i64, tpu.core_type = #tpu.core_type<tc>, window_params = [{pipeline_mode = #tpu.pipeline_mode<synchronous>, transform_indices = @transform_0, window_bounds = array<i64: 2, 144>}, {transform_indices = @transform_1, window_bounds = array<i64: 144, 768>}, {transform_indices = @transform_2, window_bounds = array<i64: 1, 768>}, {transform_indices = @transform_3, window_bounds = array<i64: 2, 768>}]} {
    %c0 = arith.constant 0 : index
    %c0_0 = arith.constant 0 : index
    %0 = vector.load %arg3[%c0, %c0_0] : memref<1x768xf32, #tpu.memory_space<vmem>>, vector<1x768xf32>
    %c0_1 = arith.constant 0 : index
    %c0_2 = arith.constant 0 : index
    %1 = vector.load %arg1[%c0_1, %c0_2] : memref<2x144xbf16, #tpu.memory_space<vmem>>, vector<2x144xbf16>
    %c0_3 = arith.constant 0 : index
    %c0_4 = arith.constant 0 : index
    %2 = vector.load %arg2[%c0_3, %c0_4] : memref<144x768xbf16, #tpu.memory_space<vmem>>, vector<144x768xbf16>
    %cst = arith.constant dense<0.000000e+00> : vector<2x768xf32>
    %3 = tpu.matmul %1, %2, %cst {dimension_numbers = #tpu.dot_dimension_numbers<[1], [0], [0], [1], [0, 0, 1, 1], [], []>} : vector<2x144xbf16>, vector<144x768xbf16>, vector<2x768xf32> -> vector<2x768xf32>
    %4 = vector.broadcast %0 : vector<1x768xf32> to vector<2x768xf32>
    %5 = arith.addf %4, %3 : vector<2x768xf32>
    %c0_5 = arith.constant 0 : index
    %c0_6 = arith.constant 0 : index
    %6 = vector.load %arg4[%c0_5, %c0_6] : memref<2x768xf32, #tpu.memory_space<vmem>>, vector<2x768xf32>
    tpu.vector_store %arg4[%c0_5, %c0_6], %5 {strides = array<i32>} : memref<2x768xf32, #tpu.memory_space<vmem>>, vector<2x768xf32>,
    return
  }
  func.func @transform_0(%arg0: i32) -> (i32, i32) {
    %c0_i32 = arith.constant 0 : i32
    %c0_i32_0 = arith.constant 0 : i32
    %c0_i32_1 = arith.constant 0 : i32
    return %c0_i32, %c0_i32_0 : i32, i32
  }
  func.func @transform_1(%arg0: i32) -> (i32, i32) {
    %c0_i32 = arith.constant 0 : i32
    %c0_i32_0 = arith.constant 0 : i32
    return %c0_i32, %arg0 : i32, i32
  }
  func.func @transform_2(%arg0: i32) -> (i32, i32) {
    %c0_i32 = arith.constant 0 : i32
    %c0_i32_0 = arith.constant 0 : i32
    return %c0_i32, %arg0 : i32, i32
  }
  func.func @transform_3(%arg0: i32) -> (i32, i32) {
    %c0_i32 = arith.constant 0 : i32
    %c0_i32_0 = arith.constant 0 : i32
    return %c0_i32, %arg0 : i32, i32
  }
}

</mosaic_0001>

<bundles_post_ra>
// kernel: tpu_custom_call.1
= control target key start
LH: loop header
LB: loop body
LE: loop exit
PB: predicated region body
PF: predicated region fallthrough
CT: control target
= control target key end

     0   :  { %8 = vsyncpa [#allocation3], 0  ;;  %s912_s0 = inlined_call_operand.hbm [shape: bf16[2,144], index: 0, kind: input, shape index: {}]   ;;  %s913_s1 = inlined_call_operand.hbm [shape: bf16[144,768], index: 1, kind: input, shape index: {}]   ;;  %s914_s2 = inlined_call_operand.vmem [shape: f32[1,768], index: 2, kind: input, shape index: {}]   ;;  %s915_s3 = inlined_call_operand.hbm [shape: f32[2,768], index: 3, kind: output, shape index: {}]  }
   0x1   :  { %9 = vsyncpa [#allocation6], 0 }
   0x2   :  { %10 = vsyncpa [#allocation4], 0  ;;  %s826_s12 = smov [#allocation2]   ;;  %s827_s14 = smov [#allocation5]  }
   0x3   :  { %s17_s13 = sshll.u32 %s826_s12, 4  ;;  %s26_s15 = sshll.u32 %s827_s14, 4  ;;  %s18_s13 = int_to_ptr.vmem [resolvable:$true] %s17_s13  ;;  %s853_s15 = int_to_ptr.vmem [resolvable:$true] %s26_s15 }
   0x4   :  { %s754_s18 = scalar_lea.hbm %s912_s0, 32 }
   0x5   :  { %p755_p0 = scmp.ne.s32.totalorder %s912_s0, %s754_s18  ;;  %p758_p1 = scmp.lt.u32.totalorder %s754_s18, %s912_s0 }
   0x7   :  { %p760_p2 = pnand %p758_p1, %p755_p0 }
   0x9   :  { %763 = shalt.err (!%p760_p2)
}
   0xa   :  { %s764_s23 = scalar_lea.vmem %s18_s13, 32  ;;  %p769_p4 = scmp.lt.s32.totalorder %s18_s13, %s18_s13 }
   0xb   :  { %p765_p3 = scmp.ne.s32.totalorder %s18_s13, %s764_s23  ;;  %p770_p5 = scmp.lt.s32.totalorder %s764_s23, %s764_s23 }
   0xd   :  { %p771_p6 = por %p770_p5, %p769_p4 }
   0xf   :  { %p772_p7 = pnand %p771_p6, %p765_p3 }
  0x11   :  { %775 = shalt.err (!%p772_p7)
}
  0x12   :  { %20 = dma.hbm_to_vmem [thread:$0]  %s912_s0, 32, %s18_s13, [#allocation3]  }
  0x13   :  { %s776_s28 = scalar_lea.hbm %s913_s1, 6912 }
  0x14   :  { %p777_p8 = scmp.ne.s32.totalorder %s913_s1, %s776_s28  ;;  %p780_p9 = scmp.lt.u32.totalorder %s776_s28, %s913_s1 }
  0x16   :  { %p782_p10 = pnand %p780_p9, %p777_p8 }
  0x18   :  { %785 = shalt.err (!%p782_p10)
}
  0x19   :  { %s786_s6 = scalar_lea.vmem %s853_s15, 6912  ;;  %p791_p12 = scmp.lt.s32.totalorder %s853_s15, %s853_s15 }
  0x1a   :  { %p787_p11 = scmp.ne.s32.totalorder %s853_s15, %s786_s6  ;;  %p792_p13 = scmp.lt.s32.totalorder %s786_s6, %s786_s6 }
  0x1c   :  { %p793_p0 = por %p792_p13, %p791_p12 }
  0x1e   :  { %p794_p1 = pnand %p793_p0, %p787_p11 }
  0x20   :  { %797 = shalt.err (!%p794_p1)
}
  0x21   :  { %s828_s0 = smov 384   ;;  %s829_s7 = smov 24  }
  0x22   :  { %32 = dma.hbm_to_vmem [thread:$0]  %s913_s1, 6912, %s853_s15, [#allocation6], %s828_s0, %s828_s0, %s829_s7  }
  0x23   :  { %820 = dma.done.wait [#allocation3], 32  }
  0x24   :  { %821 = vsyncadd [#allocation3], 4294967264 }
  0x25   :  { %822 = dma.done.wait [#allocation6], 6912  }
  0x26   :  { %823 = vsyncadd [#allocation6], 4294960384  ;;  %v673_v0 = vld [vmem:[#allocation5 + $0x4] ss:$24 sps:$4 sm:$0xff]   ;;  %v677_v2 = vld [vmem:[#allocation5] ss:$24 sps:$4 sm:$0xff]   ;;  %v110_v22 = vlaneseq }
  0x27   :  { %v675_v1 = vld [vmem:[#allocation5 + $0xc] ss:$24 sps:$4 sm:$0xff]   ;;  %396 = vmatprep.subr.bf16.mxu0 %v673_v0  ;;  %v678_v3 = vld [vmem:[#allocation5 + $0x8] ss:$24 sps:$4 sm:$0xff]   ;;  %v681_v5 = vld [vmem:[#allocation5 + $0x3c] ss:$24 sps:$4 sm:$0xff]  }
  0x28   :  { %437 = vmatprep.subr.bf16.mxu1 %v675_v1  ;;  %v679_v4 = vld [vmem:[#allocation5 + $0x34] ss:$24 sps:$4 sm:$0xff]   ;;  %397 = vmatpush1.bf16.msra.mxu0 %v677_v2  ;;  %v683_v6 = vld [vmem:[#allocation5 + $0x30] ss:$24 sps:$4 sm:$0xff]   ;;  %v685_v8 = vld [vmem:[#allocation5 + $0x64] ss:$24 sps:$4 sm:$0xff]  }
  0x29   :  { %438 = vmatpush1.bf16.msra.mxu1 %v678_v3  ;;  %398 = vmatprep.subr.bf16.mxu0 %v679_v4  ;;  %v684_v7 = vld [vmem:[#allocation5 + $0x38] ss:$24 sps:$4 sm:$0xff]   ;;  %v687_v9 = vld [vmem:[#allocation5 + $0x6c] ss:$24 sps:$4 sm:$0xff]   ;;  %v690_v11 = vld [vmem:[#allocation5 + $0x68] ss:$24 sps:$4 sm:$0xff]  }
  0x2a   :  { %439 = vmatprep.subr.bf16.mxu1 %v681_v5  ;;  %v689_v10 = vld [vmem:[#allocation5 + $0x60] ss:$24 sps:$4 sm:$0xff]   ;;  %v691_v12 = vld [vmem:[#allocation5 + $0x94] ss:$24 sps:$4 sm:$0xff]   ;;  %v695_v14 = vld [vmem:[#allocation5 + $0x90] ss:$24 sps:$4 sm:$0xff]  }
  0x2b   :  { %v693_v13 = vld [vmem:[#allocation5 + $0x9c] ss:$24 sps:$4 sm:$0xff]   ;;  %v696_v15 = vld [vmem:[#allocation5 + $0x98] ss:$24 sps:$4 sm:$0xff]   ;;  %v699_v17 = vld [vmem:[#allocation5 + $0xcc] ss:$24 sps:$4 sm:$0xff]  }
  0x2c   :  { %399 = vmatpush1.bf16.msra.mxu0 %v683_v6  ;;  %v697_v16 = vld [vmem:[#allocation5 + $0xc4] ss:$24 sps:$4 sm:$0xff]   ;;  %v701_v18 = vld [vmem:[#allocation5 + $0xc0] ss:$24 sps:$4 sm:$0xff]   ;;  %v830_v20 = vmov 1966171168  }
  0x2d   :  { %440 = vmatpush1.bf16.msra.mxu1 %v684_v7  ;;  %400 = vmatprep.subr.bf16.mxu0 %v685_v8  ;;  %v702_v19 = vld [vmem:[#allocation5 + $0xc8] ss:$24 sps:$4 sm:$0xff]   ;;  %v108_v21 = vunpack.c.l.s4 %v830_v20  ;;  %v703_v23 = vld [vmem:[#allocation5 + $0xf4] ss:$24 sps:$4 sm:$0xff]   ;;  %v884_v27 = vshrl.u32 %v110_v22, 7  ;;  %vm392_vm0 = vcmask 130048  }
  0x2e   :  { %441 = vmatprep.subr.bf16.mxu1 %v687_v9  ;;  %v705_v24 = vld [vmem:[#allocation5 + $0xfc] ss:$24 sps:$4 sm:$0xff]   ;;  %v707_v25 = vld [vmem:[#allocation5 + $0xf0] ss:$24 sps:$4 sm:$0xff]   ;;  %v711_v30 = vld [vmem:[#allocation5 + $0x12c] ss:$24 sps:$4 sm:$0xff]  }
  0x2f   :  { %v109_v26 = vunpack.c.0.s8 %v108_v21  ;;  %v708_v28 = vld [vmem:[#allocation5 + $0xf8] ss:$24 sps:$4 sm:$0xff]   ;;  %v709_v29 = vld [vmem:[#allocation5 + $0x124] ss:$24 sps:$4 sm:$0xff]   ;;  %v714_v32 = vld [vmem:[#allocation5 + $0x128] ss:$24 sps:$4 sm:$0xff]  }
  0x30   :  { %401 = vmatpush1.bf16.msra.mxu0 %v689_v10  ;;  %v713_v31 = vld [vmem:[#allocation5 + $0x120] ss:$24 sps:$4 sm:$0xff]   ;;  %v607_v34 = vld.sshfl [vmem:[#allocation2] sm:$0x11 pattern:$0x75316420] }
  0x31   :  { %442 = vmatpush1.bf16.msra.mxu1 %v690_v11  ;;  %402 = vmatprep.subr.bf16.mxu0 %v691_v12  ;;  %v112_v33 = vsub.s32 %v109_v26, %v884_v27  ;;  %v715_v35 = vld [vmem:[#allocation5 + $0x154] ss:$24 sps:$4 sm:$0xff]   ;;  %v106_v37 = vcombine.high %v607_v34, %v607_v34  ;;  %v719_v38 = vld [vmem:[#allocation5 + $0x150] ss:$24 sps:$4 sm:$0xff]   ;;  %v721_v41 = vld [vmem:[#allocation5 + $0x184] ss:$24 sps:$4 sm:$0xff]  }
  0x32   :  { %443 = vmatprep.subr.bf16.mxu1 %v693_v13  ;;  %v717_v36 = vld [vmem:[#allocation5 + $0x15c] ss:$24 sps:$4 sm:$0xff]   ;;  %v720_v40 = vld [vmem:[#allocation5 + $0x158] ss:$24 sps:$4 sm:$0xff]   ;;  %v723_v42 = vld [vmem:[#allocation5 + $0x18c] ss:$24 sps:$4 sm:$0xff]  }
  0x33   :  { %v120_v39 = vrot.slane %v106_v37, %v112_v33  ;;  %v725_v43 = vld [vmem:[#allocation5 + $0x180] ss:$24 sps:$4 sm:$0xff]   ;;  %v729_v45 = vld [vmem:[#allocation5 + $0x14] ss:$24 sps:$4 sm:$0xff]   ;;  %v113_v46 = vrot.slane %v607_v34, %v112_v33  ;;  %v727_v47 = vld [vmem:[#allocation5 + $0x10] ss:$24 sps:$4 sm:$0xff]  }
  0x34   :  { %403 = vmatpush1.bf16.msra.mxu0 %v695_v14  ;;  %v726_v44 = vld [vmem:[#allocation5 + $0x188] ss:$24 sps:$4 sm:$0xff]   ;;  %v732_v48 = vld [vmem:[#allocation5 + $0x44] ss:$24 sps:$4 sm:$0xff]   ;;  %v735_v50 = vld [vmem:[#allocation5 + $0x74] ss:$24 sps:$4 sm:$0xff]  }
  0x35   :  { %444 = vmatpush1.bf16.msra.mxu1 %v696_v15  ;;  %404 = vmatprep.subr.bf16.mxu0 %v697_v16  ;;  %v730_v49 = vld [vmem:[#allocation5 + $0x40] ss:$24 sps:$4 sm:$0xff]   ;;  %v733_v51 = vld [vmem:[#allocation5 + $0x70] ss:$24 sps:$4 sm:$0xff]   ;;  %v738_v52 = vld [vmem:[#allocation5 + $0xa4] ss:$24 sps:$4 sm:$0xff]  }
  0x36   :  { %445 = vmatprep.subr.bf16.mxu1 %v699_v17  ;;  %662 = vmatprep.mubr.msk.bf16.mxu0 %vm392_vm0, %v120_v39  ;;  %v736_v53 = vld [vmem:[#allocation5 + $0xa0] ss:$24 sps:$4 sm:$0xff]   ;;  %v741_v54 = vld [vmem:[#allocation5 + $0xd4] ss:$24 sps:$4 sm:$0xff]   ;;  %v739_v55 = vld [vmem:[#allocation5 + $0xd0] ss:$24 sps:$4 sm:$0xff]  }
  0x37   :  { %663 = vmatprep.mubr.msk.bf16.mxu1 %vm392_vm0, %v120_v39  ;;  %v744_v56 = vld [vmem:[#allocation5 + $0x104] ss:$24 sps:$4 sm:$0xff]   ;;  %v742_v57 = vld [vmem:[#allocation5 + $0x100] ss:$24 sps:$4 sm:$0xff]   ;;  %v747_v58 = vld [vmem:[#allocation5 + $0x134] ss:$24 sps:$4 sm:$0xff]  }
  0x38   :  { %405 = vmatpush1.bf16.msra.mxu0 %v701_v18  ;;  %v745_v59 = vld [vmem:[#allocation5 + $0x130] ss:$24 sps:$4 sm:$0xff]   ;;  %v750_v60 = vld [vmem:[#allocation5 + $0x164] ss:$24 sps:$4 sm:$0xff]   ;;  %v748_v61 = vld [vmem:[#allocation5 + $0x160] ss:$24 sps:$4 sm:$0xff]  }
  0x39   :  { %446 = vmatpush1.bf16.msra.mxu1 %v702_v19  ;;  %406 = vmatprep.subr.bf16.mxu0 %v703_v23  ;;  %v753_v62 = vld [vmem:[#allocation5 + $0x194] ss:$24 sps:$4 sm:$0xff]   ;;  %v751_v63 = vld [vmem:[#allocation5 + $0x190] ss:$24 sps:$4 sm:$0xff]   ;;  %v522_v0 = vsub.s32 0, %v884_v27  ;;  %v530_v1 = vsub.s32 2, %v884_v27 }
  0x3a   :  { %447 = vmatprep.subr.bf16.mxu1 %v705_v24  ;;  %v42_v2 = vld [vmem:[%s914_s2] sm:$0x3f]  ;;  %v526_v3 = vsub.s32 1, %v884_v27  ;;  %v831_v4 = vmov 1983009808   ;;  %v534_v6 = vsub.s32 3, %v884_v27 }
  0x3b   :  { %v565_v5 = vunpack.c.l.s4 %v831_v4  ;;  %v523_v7 = vrot.slane %v42_v2, %v522_v0  ;;  %v531_v8 = vrot.slane %v42_v2, %v530_v1  ;;  %s832_s2 = smov [#allocation7]  }
  0x3c   :  { %407 = vmatpush1.bf16.msra.mxu0 %v707_v25  ;;  %v527_v9 = vrot.slane %v42_v2, %v526_v3  ;;  %v535_v11 = vrot.slane %v42_v2, %v534_v6  ;;  %s597_s11 = sshll.u32 %s832_s2, 4  ;;  %s598_s11 = int_to_ptr.vmem [resolvable:$true] %s597_s11 }
  0x3d   :  { %448 = vmatpush1.bf16.msra.mxu1 %v708_v28  ;;  %408 = vmatprep.subr.bf16.mxu0 %v709_v29  ;;  %v566_v10 = vunpack.c.0.s8 %v565_v5  ;;  %s798_s12 = scalar_lea.vmem %s598_s11, 192  ;;  %p803_p3 = scmp.lt.s32.totalorder %s598_s11, %s598_s11 }
  0x3e   :  { %449 = vmatprep.subr.bf16.mxu1 %v711_v30  ;;  %p799_p2 = scmp.ne.s32.totalorder %s598_s11, %s798_s12  ;;  %p804_p4 = scmp.lt.s32.totalorder %s798_s12, %s798_s12 }
  0x3f   :  { %v569_v19 = vsub.s32 %v566_v10, %v884_v27 }
  0x40   :  { %409 = vmatpush1.bf16.msra.mxu0 %v713_v31  ;;  %v538_v31 = vsub.s32 4, %v884_v27  ;;  %p805_p5 = por %p804_p4, %p803_p3 }
  0x41   :  { %450 = vmatpush1.bf16.msra.mxu1 %v714_v32  ;;  %410 = vmatprep.subr.bf16.mxu0 %v715_v35  ;;  %v542_v32 = vsub.s32 5, %v884_v27 }
  0x42   :  { %451 = vmatprep.subr.bf16.mxu1 %v717_v36  ;;  %v539_v33 = vrot.slane %v42_v2, %v538_v31  ;;  %p806_p6 = pnand %p805_p5, %p799_p2 }
  0x43   :  { %v543_v34 = vrot.slane %v42_v2, %v542_v32 }
  0x44   :  { %411 = vmatpush1.bf16.msra.mxu0 %v719_v38 }
  0x45   :  { %452 = vmatpush1.bf16.msra.mxu1 %v720_v40  ;;  %412 = vmatprep.subr.bf16.mxu0 %v721_v41 }
  0x46   :  { %453 = vmatprep.subr.bf16.mxu1 %v723_v42 }
  0x48   :  { %413 = vmatpush1.bf16.msra.mxu0 %v725_v43 }
  0x49   :  { %454 = vmatpush1.bf16.msra.mxu1 %v726_v44  ;;  %478 = vmatprep.subr.bf16.mxu0 %v729_v45 }
  0x4b   :  { %429 = vmatmul.mubr.bf16.vlgmr.msra.gmra.mrb[0].mxu0 %v113_v46 }
  0x4c   :  { %470 = vmatmul.mubr.bf16.vlgmr.msra.gmra.mrb[0].mxu1 %v113_v46  ;;  %479 = vmatpush1.bf16.msra.mxu0 %v727_v47 }
  0x4d   :  { %664 = vmatprep.mubr.msk.bf16.mxu0 %vm392_vm0, %v120_v39  ;;  %480 = vmatprep.subr.bf16.mxu0 %v732_v48 }
  0x50   :  { %481 = vmatpush1.bf16.msra.mxu0 %v730_v49 }
  0x51   :  { %482 = vmatprep.subr.bf16.mxu0 %v735_v50 }
  0x54   :  { %483 = vmatpush1.bf16.msra.mxu0 %v733_v51 }
  0x55   :  { %484 = vmatprep.subr.bf16.mxu0 %v738_v52 }
  0x58   :  { %485 = vmatpush1.bf16.msra.mxu0 %v736_v53 }
  0x59   :  { %486 = vmatprep.subr.bf16.mxu0 %v741_v54 }
  0x5c   :  { %487 = vmatpush1.bf16.msra.mxu0 %v739_v55 }
  0x5d   :  { %488 = vmatprep.subr.bf16.mxu0 %v744_v56 }
  0x60   :  { %489 = vmatpush1.bf16.msra.mxu0 %v742_v57 }
  0x61   :  { %490 = vmatprep.subr.bf16.mxu0 %v747_v58 }
  0x64   :  { %491 = vmatpush1.bf16.msra.mxu0 %v745_v59 }
  0x65   :  { %492 = vmatprep.subr.bf16.mxu0 %v750_v60 }
  0x68   :  { %493 = vmatpush1.bf16.msra.mxu0 %v748_v61 }
  0x69   :  { %494 = vmatprep.subr.bf16.mxu0 %v753_v62 }
  0x6c   :  { %495 = vmatpush1.bf16.msra.mxu0 %v751_v63 }
  0x6f   :  { %511 = vmatmul.mubr.bf16.vlgmr.msra.gmra.mrb[4].mxu0 %v113_v46 }
 0x11e   :  { %v430_v12 = vpop.f32.mrb[0].mxu0 }
 0x11f   :  { %v471_v13 = vpop.f32.mrb[0].mxu1  ;;  %v550_v14 = vadd.f32 %v523_v7, %v430_v12  ;;  %v432_v16 = vpop.f32.mrb[1].mxu0 }
 0x120   :  { %v552_v15 = vadd.f32 %v531_v8, %v471_v13  ;;  %v473_v17 = vpop.f32.mrb[1].mxu1  ;;  %v551_v18 = vadd.f32 %v527_v9, %v432_v16  ;;  %v434_v21 = vpop.f32.mrb[2].mxu0 }
 0x121   :  { %v553_v20 = vadd.f32 %v535_v11, %v473_v17  ;;  %v475_v22 = vpop.f32.mrb[2].mxu1  ;;  %v435_v23 = vpop.f32.mrb[3].mxu0 }
 0x122   :  { %v476_v24 = vpop.f32.mrb[3].mxu1  ;;  %v562_v25 = vcombine.low %v550_v14, %v551_v18 }
 0x123   :  { %v563_v26 = vcombine.low %v552_v15, %v553_v20 }
 0x124   :  { %v570_v28 = vrot.slane %v562_v25, %v569_v19 }
 0x125   :  { %v577_v29 = vrot.slane %v563_v26, %v569_v19 }
 0x127   :  { %v578_v30 = vcombine.low %v570_v28, %v577_v29 }
 0x129   :  { %589 = vst [vmem:[#allocation7] sm:$0xff] %v578_v30 }
 0x142   :  { %v512_v35 = vpop.f32.mrb[4].mxu0 }
 0x143   :  { %v554_v36 = vadd.f32 %v539_v33, %v512_v35  ;;  %v514_v37 = vpop.f32.mrb[5].mxu0 }
 0x144   :  { %v555_v38 = vadd.f32 %v543_v34, %v514_v37  ;;  %v516_v39 = vpop.f32.mrb[6].mxu0 }
 0x145   :  { %v517_v40 = vpop.f32.mrb[7].mxu0 }
 0x146   :  { %v579_v41 = vcombine.low %v554_v36, %v555_v38 }
 0x148   :  { %665 = vst.sshfl [vmem:[#allocation7 + $0x8] sm:$0x33 pattern:$0x76325410] %v579_v41 }
 0x149   :  { %809 = shalt.err (!%p806_p6)
}
 0x14a   :  { %s810_s15 = scalar_lea.hbm %s915_s3, 192 }
 0x14b   :  { %p811_p7 = scmp.ne.s32.totalorder %s915_s3, %s810_s15  ;;  %p814_p8 = scmp.lt.u32.totalorder %s810_s15, %s915_s3 }
 0x14d   :  { %p816_p9 = pnand %p814_p8, %p811_p7 }
 0x14f   :  { %819 = shalt.err (!%p816_p9)
}
 0x150   :  { %600 = dma.vmem_to_hbm [thread:$0]  %s598_s11, 192, %s915_s3, [#allocation4]  }
 0x151   :  { %824 = dma.done.wait [#allocation4], 192  }
 0x152   :  { %825 = vsyncadd [#allocation4], 4294967104 }
 0x153   :  { %604 = vsyncpa [#allocation3], 1 }
 0x154   :  { %605 = vsyncpa [#allocation6], 1 }
 0x155   :  { %606 = vsyncpa [#allocation4], 1 }

</bundles_post_ra>
